<compile_context>
chip_gen: v7x
topology: tpu7x:2x2x1
jax: 0.10.0
libtpu: 0.0.40
codegen_flags: <defaults>
</compile_context>

<pallas_src>
from functools import partial

import jax
import jax.numpy as jnp
from jax.experimental import pallas as pl
from jax.experimental.pallas import tpu as pltpu

LANE = 128      # vreg lane width
SUBLANE = 8     # vreg sublane height
NEG_LOGIT = -1e30   # padded-action bias; fine in f32/bf16 (do NOT use with fp16)


def _round_up(x, m):
    return ((x + m - 1) // m) * m


def net_kernel(sT_ref, w1_ref, b1_ref, w2_ref, b2_ref, out_ref, *, num_actions):
    """One batch tile, batch on the lane axis: out^T = softmax(W2 @ relu(W1 @ s^T + b1) + b2)."""
    sT = sT_ref[...]                      # (F, bt)
    w1 = w1_ref[...]                      # (Hp, F)
    F, bt = sT.shape
    Hp = w1.shape[0]

    # fc1 + ReLU: tiny contraction dim (F = 2) -> unrolled broadcast-FMAs on the VPU
    # (an MXU matmul here would be >98% zero padding).
    acc = jnp.broadcast_to(b1_ref[...], (Hp, bt))       # (Hp, bt)
    if F <= 8:
        for f in range(F):                # static unroll at trace time
            acc = acc + w1[:, f:f + 1] * sT[f:f + 1, :]
    else:                                 # generic fallback (not hit for MountainCar)
        acc = acc + jnp.dot(w1, sT, preferred_element_type=jnp.float32)
    hT = jnp.maximum(acc, 0.0)            # (Hp, bt)

    # fc3 on the MXU: (Ap, Hp) @ (Hp, bt) -> (Ap, bt).  FLOPs are negligible.
    # Padded action rows have zero weights and bias NEG_LOGIT.
    a = jnp.dot(w2_ref[...], hT, preferred_element_type=jnp.float32) + b2_ref[...]

    # Numerically stable softmax across the `num_actions` real sublane rows,
    # independently per lane (= per batch element).  Row-unrolled max/add keeps
    # this on the VPU (no XLU reductions).
    A = num_actions
    m = a[0:1, :]
    for j in range(1, A):
        m = jnp.maximum(m, a[j:j + 1, :])
    e = jnp.exp(a - m)                    # padded rows: exp(-1e30 - m) == 0 exactly
    denom = e[0:1, :]
    for j in range(1, A):
        denom = denom + e[j:j + 1, :]
    # Exact normalization (no approx reciprocal): probs feed a Categorical sampler.
    out_ref[...] = e * (1.0 / denom)      # (Ap, bt); padded rows are exactly 0


def prepare_params(w1, b1, w2, b2):
    """Pad PyTorch-convention params into the kernel layout ONCE (hoisted out of
    the per-call path).

    w1: (H, F) = fc1.weight, b1: (H,) = fc1.bias, w2: (A, H) = fc3.weight,
    b2: (A,) = fc3.bias.

    Invariants the kernel relies on: padded hidden rows of w1/b1 and the matching
    w2 columns are exactly zero (so padded hidden units are inert), and padded
    action rows of w2 are zero with bias NEG_LOGIT (so they softmax to exactly 0).
    """
    H, F = w1.shape
    A = w2.shape[0]
    Hp = _round_up(H, SUBLANE)
    Ap = _round_up(A, SUBLANE)
    w1p = jnp.zeros((Hp, F), jnp.float32).at[:H, :].set(w1.astype(jnp.float32))
    b1p = jnp.zeros((Hp, 1), jnp.float32).at[:H, 0].set(
        jnp.reshape(b1, (H,)).astype(jnp.float32))
    w2p = jnp.zeros((Ap, Hp), jnp.float32).at[:A, :H].set(w2.astype(jnp.float32))
    b2p = jnp.full((Ap, 1), NEG_LOGIT, jnp.float32).at[:A, 0].set(
        jnp.reshape(b2, (A,)).astype(jnp.float32))
    return w1p, b1p, w2p, b2p


@partial(jax.jit, static_argnames=("num_actions", "batch_tile"))
def net_forward(s, params, *, num_actions, batch_tile=4096):
    """softmax(fc3(relu(fc1(s))), dim=1).  s: (B, F) float -> (B, num_actions)."""
    w1p, b1p, w2p, b2p = params
    B, F = s.shape
    Hp = w1p.shape[0]
    Ap = w2p.shape[0]

    # Batch lives on the lane axis inside the kernel (fuses under jit).
    sT = s.astype(jnp.float32).T          # (F, B)

    # Lane-aligned batch tile.  For B <= 128 a single full-array block (always
    # legal).  For larger B aim for >= 2 tiles so the "parallel" grid axis can
    # shard across v7x's two TensorCores; per-tile VMEM is trivial even at 4096.
    if B <= LANE:
        bt = B
    else:
        bt = min(batch_tile, _round_up(pl.cdiv(B, 2), LANE))
        bt = _round_up(max(bt, LANE), LANE)
    # Ragged last tile: OOB lanes read garbage but the softmax is purely per-lane
    # (no cross-lane mixing) and Pallas masks their writes, so real lanes are safe.
    grid = pl.cdiv(B, bt)

    outT = pl.pallas_call(
        partial(net_kernel, num_actions=num_actions),
        out_shape=jax.ShapeDtypeStruct((Ap, B), jnp.float32),
        grid=(grid,),
        in_specs=[
            pl.BlockSpec((F, bt), lambda i: (0, i)),
            # Constant block index -> the tiny weights stay VMEM-resident across tiles.
            pl.BlockSpec((Hp, F), lambda i: (0, 0)),
            pl.BlockSpec((Hp, 1), lambda i: (0, 0)),
            pl.BlockSpec((Ap, Hp), lambda i: (0, 0)),
            pl.BlockSpec((Ap, 1), lambda i: (0, 0)),
        ],
        out_specs=pl.BlockSpec((Ap, bt), lambda i: (0, i)),
        compiler_params=pltpu.CompilerParams(
            dimension_semantics=("parallel",),   # batch tiles shard across TCs (v7x)
        ),
    )(sT, w1p, b1p, w2p, b2p)

    # Drop sublane padding rows and put batch back on axis 0 (fused under jit).
    return outT[:num_actions, :].T


def init_params(key, num_feats, num_actions, hidden=24):
    """nn.Linear-style uniform init, PyTorch (out_features, in_features) convention."""
    k1, k2, k3, k4 = jax.random.split(key, 4)
    lim1 = 1.0 / (num_feats ** 0.5)
    lim2 = 1.0 / (hidden ** 0.5)
    w1 = jax.random.uniform(k1, (hidden, num_feats), jnp.float32, -lim1, lim1)
    b1 = jax.random.uniform(k2, (hidden,), jnp.float32, -lim1, lim1)
    w2 = jax.random.uniform(k3, (num_actions, hidden), jnp.float32, -lim2, lim2)
    b2 = jax.random.uniform(k4, (num_actions,), jnp.float32, -lim2, lim2)
    return w1, b1, w2, b2


def ref_forward(s, w1, b1, w2, b2):
    h = jnp.maximum(s @ w1.T + b1, 0.0)
    a = h @ w2.T + b2
    return jax.nn.softmax(a, axis=1)


if __name__ == "__main__":
    key = jax.random.PRNGKey(0)
    batch, num_feats, num_actions = 8, 2, 3   # MountainCar: 2 features, 3 actions
    k_in, k_par = jax.random.split(key)
    s = jax.random.normal(k_in, (batch, num_feats), jnp.float32)

    w1, b1, w2, b2 = init_params(k_par, num_feats, num_actions)
    params = prepare_params(w1, b1, w2, b2)   # padded once, reused every call

    out = net_forward(s, params, num_actions=num_actions)
    jax.block_until_ready(out)

    expected = ref_forward(s, w1, b1, w2, b2)
    assert out.shape == (batch, num_actions)
    assert jnp.allclose(jnp.sum(out, axis=1), 1.0, atol=1e-4)
    assert jnp.allclose(out, expected, atol=1e-4, rtol=1e-4)

    # Exercise the multi-tile grid + ragged last batch tile path.
    s_big = jax.random.normal(jax.random.PRNGKey(1), (300, num_feats), jnp.float32)
    out_big = net_forward(s_big, params, num_actions=num_actions, batch_tile=128)
    jax.block_until_ready(out_big)
    assert out_big.shape == (300, num_actions)
    assert jnp.allclose(out_big, ref_forward(s_big, w1, b1, w2, b2), atol=1e-4, rtol=1e-4)

    print("KERNEL_OK")
</pallas_src>

<mosaic_0001>
module attributes {stable_mosaic.version = 11 : i64} {
  func.func @net_kernel(%arg0: i32, %arg1: memref<2x8xf32, #tpu.memory_space<vmem>>, %arg2: memref<24x2xf32, #tpu.memory_space<vmem>>, %arg3: memref<24x1xf32, #tpu.memory_space<vmem>>, %arg4: memref<8x24xf32, #tpu.memory_space<vmem>>, %arg5: memref<8x1xf32, #tpu.memory_space<vmem>>, %arg6: memref<8x8xf32, #tpu.memory_space<vmem>>) attributes {dimension_semantics = [#tpu.dimension_semantics<parallel>], iteration_bounds = array<i64: 1>, scalar_prefetch = 0 : i64, scratch_operands = 0 : i64, tpu.core_type = #tpu.core_type<tc>, window_params = [{transform_indices = @transform_0, window_bounds = array<i64: 2, 8>}, {pipeline_mode = #tpu.pipeline_mode<synchronous>, transform_indices = @transform_1, window_bounds = array<i64: 24, 2>}, {pipeline_mode = #tpu.pipeline_mode<synchronous>, transform_indices = @transform_2, window_bounds = array<i64: 24, 1>}, {pipeline_mode = #tpu.pipeline_mode<synchronous>, transform_indices = @transform_3, window_bounds = array<i64: 8, 24>}, {pipeline_mode = #tpu.pipeline_mode<synchronous>, transform_indices = @transform_4, window_bounds = array<i64: 8, 1>}, {transform_indices = @transform_5, window_bounds = array<i64: 8, 8>}]} {
    %c0 = arith.constant 0 : index
    %c0_0 = arith.constant 0 : index
    %0 = vector.load %arg1[%c0, %c0_0] : memref<2x8xf32, #tpu.memory_space<vmem>>, vector<2x8xf32>
    %c0_1 = arith.constant 0 : index
    %c0_2 = arith.constant 0 : index
    %1 = vector.load %arg2[%c0_1, %c0_2] : memref<24x2xf32, #tpu.memory_space<vmem>>, vector<24x2xf32>
    %c0_3 = arith.constant 0 : index
    %c0_4 = arith.constant 0 : index
    %2 = vector.load %arg3[%c0_3, %c0_4] : memref<24x1xf32, #tpu.memory_space<vmem>>, vector<24x1xf32>
    %3 = vector.shape_cast %2 : vector<24x1xf32> to vector<24x1xf32>
    %4 = vector.broadcast %3 : vector<24x1xf32> to vector<24x8xf32>
    %5 = vector.extract_strided_slice %1 {offsets = [0, 0], sizes = [24, 1], strides = [1, 1]} : vector<24x2xf32> to vector<24x1xf32>
    %6 = vector.extract_strided_slice %0 {offsets = [0, 0], sizes = [1, 8], strides = [1, 1]} : vector<2x8xf32> to vector<1x8xf32>
    %7 = vector.broadcast %5 : vector<24x1xf32> to vector<24x8xf32>
    %8 = vector.broadcast %6 : vector<1x8xf32> to vector<24x8xf32>
    %9 = arith.mulf %7, %8 : vector<24x8xf32>
    %10 = arith.addf %4, %9 : vector<24x8xf32>
    %11 = vector.extract_strided_slice %1 {offsets = [0, 1], sizes = [24, 1], strides = [1, 1]} : vector<24x2xf32> to vector<24x1xf32>
    %12 = vector.extract_strided_slice %0 {offsets = [1, 0], sizes = [1, 8], strides = [1, 1]} : vector<2x8xf32> to vector<1x8xf32>
    %13 = vector.broadcast %11 : vector<24x1xf32> to vector<24x8xf32>
    %14 = vector.broadcast %12 : vector<1x8xf32> to vector<24x8xf32>
    %15 = arith.mulf %13, %14 : vector<24x8xf32>
    %16 = arith.addf %10, %15 : vector<24x8xf32>
    %cst = arith.constant 0.000000e+00 : f32
    %17 = vector.broadcast %cst : f32 to vector<24x8xf32>
    %18 = arith.maximumf %16, %17 : vector<24x8xf32>
    %c0_5 = arith.constant 0 : index
    %c0_6 = arith.constant 0 : index
    %19 = vector.load %arg4[%c0_5, %c0_6] : memref<8x24xf32, #tpu.memory_space<vmem>>, vector<8x24xf32>
    %cst_7 = arith.constant dense<0.000000e+00> : vector<8x8xf32>
    %20 = tpu.matmul %19, %18, %cst_7 {dimension_numbers = #tpu.dot_dimension_numbers<[1], [0], [0], [1], [0, 0, 1, 1], [], []>} : vector<8x24xf32>, vector<24x8xf32>, vector<8x8xf32> -> vector<8x8xf32>
    %c0_8 = arith.constant 0 : index
    %c0_9 = arith.constant 0 : index
    %21 = vector.load %arg5[%c0_8, %c0_9] : memref<8x1xf32, #tpu.memory_space<vmem>>, vector<8x1xf32>
    %22 = vector.broadcast %21 : vector<8x1xf32> to vector<8x8xf32>
    %23 = arith.addf %20, %22 : vector<8x8xf32>
    %24 = vector.extract_strided_slice %23 {offsets = [0, 0], sizes = [1, 8], strides = [1, 1]} : vector<8x8xf32> to vector<1x8xf32>
    %25 = vector.extract_strided_slice %23 {offsets = [1, 0], sizes = [1, 8], strides = [1, 1]} : vector<8x8xf32> to vector<1x8xf32>
    %26 = arith.maximumf %24, %25 : vector<1x8xf32>
    %27 = vector.extract_strided_slice %23 {offsets = [2, 0], sizes = [1, 8], strides = [1, 1]} : vector<8x8xf32> to vector<1x8xf32>
    %28 = arith.maximumf %26, %27 : vector<1x8xf32>
    %29 = vector.broadcast %28 : vector<1x8xf32> to vector<8x8xf32>
    %30 = arith.subf %23, %29 : vector<8x8xf32>
    %31 = math.exp %30 : vector<8x8xf32>
    %32 = vector.extract_strided_slice %31 {offsets = [0, 0], sizes = [1, 8], strides = [1, 1]} : vector<8x8xf32> to vector<1x8xf32>
    %33 = vector.extract_strided_slice %31 {offsets = [1, 0], sizes = [1, 8], strides = [1, 1]} : vector<8x8xf32> to vector<1x8xf32>
    %34 = arith.addf %32, %33 : vector<1x8xf32>
    %35 = vector.extract_strided_slice %31 {offsets = [2, 0], sizes = [1, 8], strides = [1, 1]} : vector<8x8xf32> to vector<1x8xf32>
    %36 = arith.addf %34, %35 : vector<1x8xf32>
    %cst_10 = arith.constant 1.000000e+00 : f32
    %37 = vector.broadcast %cst_10 : f32 to vector<1x8xf32>
    %38 = arith.divf %37, %36 : vector<1x8xf32>
    %39 = vector.broadcast %38 : vector<1x8xf32> to vector<8x8xf32>
    %40 = arith.mulf %31, %39 : vector<8x8xf32>
    %c0_11 = arith.constant 0 : index
    %c0_12 = arith.constant 0 : index
    %41 = vector.load %arg6[%c0_11, %c0_12] : memref<8x8xf32, #tpu.memory_space<vmem>>, vector<8x8xf32>
    tpu.vector_store %arg6[%c0_11, %c0_12], %40 {strides = array<i32>} : memref<8x8xf32, #tpu.memory_space<vmem>>, vector<8x8xf32>,
    return
  }
  func.func @transform_0(%arg0: i32) -> (i32, i32) {
    %c0_i32 = arith.constant 0 : i32
    %c0_i32_0 = arith.constant 0 : i32
    return %c0_i32, %arg0 : i32, i32
  }
  func.func @transform_1(%arg0: i32) -> (i32, i32) {
    %c0_i32 = arith.constant 0 : i32
    %c0_i32_0 = arith.constant 0 : i32
    %c0_i32_1 = arith.constant 0 : i32
    return %c0_i32, %c0_i32_0 : i32, i32
  }
  func.func @transform_2(%arg0: i32) -> (i32, i32) {
    %c0_i32 = arith.constant 0 : i32
    %c0_i32_0 = arith.constant 0 : i32
    %c0_i32_1 = arith.constant 0 : i32
    return %c0_i32, %c0_i32_0 : i32, i32
  }
  func.func @transform_3(%arg0: i32) -> (i32, i32) {
    %c0_i32 = arith.constant 0 : i32
    %c0_i32_0 = arith.constant 0 : i32
    %c0_i32_1 = arith.constant 0 : i32
    return %c0_i32, %c0_i32_0 : i32, i32
  }
  func.func @transform_4(%arg0: i32) -> (i32, i32) {
    %c0_i32 = arith.constant 0 : i32
    %c0_i32_0 = arith.constant 0 : i32
    %c0_i32_1 = arith.constant 0 : i32
    return %c0_i32, %c0_i32_0 : i32, i32
  }
  func.func @transform_5(%arg0: i32) -> (i32, i32) {
    %c0_i32 = arith.constant 0 : i32
    %c0_i32_0 = arith.constant 0 : i32
    return %c0_i32, %arg0 : i32, i32
  }
}

</mosaic_0001>

<bundles_post_ra>
// kernel: net_forward.1
= control target key start
LH: loop header
LB: loop body
LE: loop exit
PB: predicated region body
PF: predicated region fallthrough
CT: control target
= control target key end

     0   :  { %v241_v0 = vmov 0   ;;  %v242_v5 = vmov 1   ;;  %v243_v8 = vmov 0.0|0.0   ;;  %vm244_vm0 = vmmov 0   ;;  %s306_s2 = inlined_call_operand.vmem [shape: f32[24,1], index: 2, kind: input, shape index: {}]   ;;  %s307_s1 = inlined_call_operand.vmem [shape: f32[24,2], index: 1, kind: input, shape index: {}]   ;;  %s308_s4 = inlined_call_operand.vmem [shape: f32[8,1], index: 4, kind: input, shape index: {}]   ;;  %s309_s0 = inlined_call_operand.vmem [shape: f32[2,8], index: 0, kind: input, shape index: {}]   ;;  %s310_s3 = inlined_call_operand.vmem [shape: f32[8,24], index: 3, kind: input, shape index: {}]   ;;  %s311_s5 = inlined_call_operand.vmem [shape: f32[8,8], index: 5, kind: output, shape index: {}]  }
   0x1   :  { %230 = vset.pattern.permute.xlu1 %v241_v0  ;;  %229 = vset.pattern.permute.xlu0 %v241_v0  ;;  %v24_v1 = vld [vmem:[%s306_s2] sm:$0xff]  ;;  %v25_v3 = vld [vmem:[%s306_s2 + $0x8] sm:$0xff]  ;;  %v23_v6 = vld [vmem:[%s307_s1 + $0x10] sm:$0xff]  ;;  %v245_v9 = vmov 0.0   ;;  %v57_v11 = vlaneseq  ;;  %vm99_vm1 = vcmask 195584   ;;  %vm201_vm2 = vcmask 64512  }
   0x2   :  { %v21_v2 = vld [vmem:[%s307_s1] sm:$0xff]  ;;  %29 = vperm.xlu1 %230, %v24_v1   ;;  %v22_v4 = vld [vmem:[%s307_s1 + $0x8] sm:$0xff]  ;;  %v26_v7 = vld [vmem:[%s306_s2 + $0x10] sm:$0xff]  ;;  %221 = vmatprep.subr.bf16.mxu0 %v243_v8 }
   0x3   :  { %44 = vperm.xlu0 %229, %v21_v2   ;;  %218 = vmatprep.mubr.msk.f32.mxu0 %vm244_vm0, %v245_v9  ;;  %v93_v10 = vld [vmem:[%s308_s4] sm:$0xff]  ;;  %v58_v12 = vshrl.u32 %v57_v11, 7 }
   0x4   :  { %v20_v14 = vld [vmem:[%s309_s0] sm:$0x3] }
   0x5   :  { %v59_v13 = vsub.s32 0, %v58_v12  ;;  %v81_v18 = vsub.s32 1, %v58_v12  ;;  %v92_v43 = vld [vmem:[%s310_s3] sm:$0xff] }
   0x6   :  { %34 = vperm.xlu1 %230, %v25_v3  }
   0x7   :  { %49 = vperm.xlu0 %229, %v22_v4   ;;  %v60_v17 = vrot.slane %v20_v14, %v59_v13  ;;  %v82_v23 = vrot.slane %v20_v14, %v81_v18 }
   0xa   :  { %232 = vset.pattern.permute.xlu1 %v242_v5 }
   0xb   :  { %231 = vset.pattern.permute.xlu0 %v242_v5  ;;  %72 = vperm.xlu1 %232, %v22_v4  }
   0xc   :  { %68 = vperm.xlu0 %231, %v21_v2  }
   0xf   :  { %233 = vset.pattern.permute.xlu1 %v241_v0 }
  0x10   :  { %234 = vset.pattern.permute.xlu0 %v241_v0  ;;  %54 = vperm.xlu1 %233, %v23_v6  }
  0x11   :  { %39 = vperm.xlu0 %234, %v26_v7  }
  0x14   :  { %235 = vset.pattern.permute.xlu1 %v242_v5 }
  0x15   :  { %76 = vperm.xlu1 %235, %v23_v6  }
  0x19   :  { %236 = vset.pattern.permute.xlu1 %v241_v0 }
  0x1a   :  { %96 = vperm.xlu1 %236, %v93_v10  }
  0x81   :  { %v30_v15 = vpop.permute.xlu1 %29 }
  0x82   :  { %v45_v16 = vpop.permute.xlu0 %44 }
  0x83   :  { %v61_v21 = vmul.f32 %v60_v17, %v45_v16 }
  0x85   :  { %v35_v19 = vpop.permute.xlu1 %34  ;;  %v64_v26 = vadd.f32 %v61_v21, %v30_v15 }
  0x86   :  { %v50_v20 = vpop.permute.xlu0 %49 }
  0x87   :  { %v62_v22 = vmul.f32 %v60_v17, %v50_v20 }
  0x89   :  { %v65_v27 = vadd.f32 %v62_v22, %v35_v19 }
  0x8a   :  { %v73_v24 = vpop.permute.xlu1 %72 }
  0x8b   :  { %v69_v25 = vpop.permute.xlu0 %68  ;;  %v84_v28 = vmul.f32 %v82_v23, %v73_v24 }
  0x8c   :  { %v83_v29 = vmul.f32 %v82_v23, %v69_v25 }
  0x8d   :  { %v87_v30 = vadd.f32 %v84_v28, %v65_v27 }
  0x8e   :  { %v86_v31 = vadd.f32 %v83_v29, %v64_v26 }
  0x8f   :  { %v90_v32 = vmax.f32 %v87_v30, 0.0  ;;  %v55_v34 = vpop.permute.xlu1 %54 }
  0x90   :  { %v89_v33 = vmax.f32 %v86_v31, 0.0  ;;  %v63_v35 = vmul.f32 %v60_v17, %v55_v34  ;;  %v40_v37 = vpop.permute.xlu0 %39 }
  0x92   :  { %v222_v36 = vpack.c.bf16 %v90_v32, %v89_v33  ;;  %v66_v39 = vadd.f32 %v63_v35, %v40_v37 }
  0x94   :  { %223 = vmatpush3.bf16.msra.mxu0 %v222_v36  ;;  %v77_v38 = vpop.permute.xlu1 %76 }
  0x95   :  { %216 = vmatprep.subr.mxu0 %v245_v9  ;;  %v85_v40 = vmul.f32 %v82_v23, %v77_v38 }
  0x97   :  { %v88_v41 = vadd.f32 %v85_v40, %v66_v39 }
  0x99   :  { %v91_v42 = vmax.f32 %v88_v41, 0.0  ;;  %v97_v44 = vpop.permute.xlu1 %96 }
  0x9b   :  { %217 = vmatpush3.msra.mxu0 %v91_v42 }
  0x9c   :  { %219 = vmatmul.mubr.msk.f32.vlgmr.msra.gmra.mrb[0].mxu0 %vm99_vm1, %v92_v43 }
 0x16f   :  { %v169_v45 = vpop.f32.mrb[0].mxu0 }
 0x170   :  { %v170_v46 = vadd.f32 %v169_v45, %v97_v44  ;;  %v220_v47 = vpop.f32.mrb[1].mxu0 }
 0x172   :  { %v174_v48 = vrot.slane %v170_v46, 1  ;;  %v177_v50 = vrot.slane %v170_v46, 2 }
 0x174   :  { %v176_v49 = vmax.f32 %v170_v46, %v174_v48 }
 0x176   :  { %v179_v51 = vmax.f32 %v176_v49, %v177_v50 }
 0x178   :  { %v183_v52 = vrot.slane %v179_v51, %v59_v13 }
 0x17a   :  { %v184_v53 = vsub.f32 %v170_v46, %v183_v52 }
 0x17c   :  { %v185_v54 = vmul.f32 1.442695, %v184_v53 }
 0x17e   :  { %237 = vpow2.f32 %v185_v54 }
 0x188   :  { %v238_v55 = vpop.eup %237 }
 0x189   :  { %v188_v56 = vrot.slane %v238_v55, 1  ;;  %v191_v58 = vrot.slane %v238_v55, 2 }
 0x18b   :  { %v190_v57 = vadd.f32 %v238_v55, %v188_v56 }
 0x18d   :  { %v193_v59 = vadd.f32 %v191_v58, %v190_v57 }
 0x18f   :  { %239 = vrcp.f32 %v193_v59 }
 0x199   :  { %v240_v60 = vpop.eup %239 }
 0x19a   :  { %v199_v61 = vrot.slane %v240_v60, %v59_v13 }
 0x19c   :  { %v200_v62 = vmul.f32 %v238_v55, %v199_v61 }
 0x19e   :  { %202 = vst.msk [vmem:[%s311_s5] sm:$0xff] %vm201_vm2, %v200_v62 }

</bundles_post_ra>
